<compile_context>
chip_gen: v7x
topology: tpu7x:2x2x1
jax: 0.10.0
libtpu: 0.0.40
codegen_flags: <defaults>
</compile_context>

<pallas_src>
import jax
import jax.numpy as jnp
from jax.experimental import pallas as pl
from jax.experimental.pallas import tpu as pltpu

_LANES = 128
_SUBLANES = 8
_TILE = _LANES * _SUBLANES  # 1024 elements -> one full (8,128) f32 vreg


def _linear2_kernel(w_ref, b_ref, x1_ref, x2_ref, y1_ref, y2_ref):
    # w_ref: SMEM (4,)  row-major torch weight [w00, w01, w10, w11]
    # b_ref: SMEM (2,)
    # x*_ref / y*_ref: VMEM (2, R, 128) lane-dense feature-major slabs
    w00 = w_ref[0]
    w01 = w_ref[1]
    w10 = w_ref[2]
    w11 = w_ref[3]
    b0 = b_ref[0]
    b1 = b_ref[1]

    def apply(x_ref, y_ref):
        f0 = x_ref[0]            # (R, 128) — full (8,128) tiles, VPU only
        f1 = x_ref[1]
        y_ref[0] = (f0 * w00 + f1 * w01 + b0).astype(y_ref.dtype)
        y_ref[1] = (f0 * w10 + f1 * w11 + b1).astype(y_ref.dtype)

    apply(x1_ref, y1_ref)
    apply(x2_ref, y2_ref)


def _to_slab(x):
    """(..., 2) array -> ((2, R, 128) lane-dense slab, n_rows)."""
    n = x.size // 2
    n_pad = ((n + _TILE - 1) // _TILE) * _TILE
    flat = x.reshape(n, 2).T                       # (2, n) feature-major
    flat = jnp.pad(flat, ((0, 0), (0, n_pad - n)))
    return flat.reshape(2, n_pad // _LANES, _LANES), n


def _from_slab(y_slab, n, out_shape):
    return y_slab.reshape(2, -1)[:, :n].T.reshape(out_shape)


def _dual_linear(weight, bias, x1, x2):
    """Apply Linear(2, 2) over the last dim of x1 and x2 in one pallas_call."""
    s1, n1 = _to_slab(x1)
    s2, n2 = _to_slab(x2)
    w_flat = weight.reshape(4)                     # [w00, w01, w10, w11]
    y1s, y2s = pl.pallas_call(
        _linear2_kernel,
        out_shape=(
            jax.ShapeDtypeStruct(s1.shape, x1.dtype),
            jax.ShapeDtypeStruct(s2.shape, x2.dtype),
        ),
        in_specs=[
            pl.BlockSpec(memory_space=pltpu.MemorySpace.SMEM),   # weight
            pl.BlockSpec(memory_space=pltpu.MemorySpace.SMEM),   # bias
            pl.BlockSpec(memory_space=pltpu.MemorySpace.VMEM),   # x1 slab
            pl.BlockSpec(memory_space=pltpu.MemorySpace.VMEM),   # x2 slab
        ],
        out_specs=(
            pl.BlockSpec(memory_space=pltpu.MemorySpace.VMEM),
            pl.BlockSpec(memory_space=pltpu.MemorySpace.VMEM),
        ),
    )(w_flat, bias, s1, s2)
    return _from_slab(y1s, n1, x1.shape), _from_slab(y2s, n2, x2.shape)


def model_forward(x1, x2, weight, bias):
    # y1 = Linear(x1), y2 = Linear(x2): each input element processed exactly once.
    y1, y2 = _dual_linear(weight, bias, x1, x2)
    y12 = jnp.concatenate([y1, y2], axis=1)                  # == Linear(v1)
    # v3 = v1[:, 0:x2.size(3)^2] with torch's clamped slicing; the slice may
    # spill past x1's channels into x2's, so take it from the assembled y12.
    s = min(x2.shape[3] * x2.shape[3], y12.shape[1])
    return jnp.concatenate([y12, y12[:, 0:s]], axis=1)       # == Linear(v4)


if __name__ == "__main__":
    key = jax.random.PRNGKey(0)
    k1, k2, kw, kb = jax.random.split(key, 4)

    # x2.size(3) must exist -> 4-D inputs; last dim == Linear in_features == 2
    x1 = jax.random.normal(k1, (2, 4, 8, 2), dtype=jnp.float32)
    x2 = jax.random.normal(k2, (2, 4, 8, 2), dtype=jnp.float32)

    # Deterministic Linear(2, 2) parameters (synthetic init, no checkpoint).
    weight = jax.random.normal(kw, (2, 2), dtype=jnp.float32) * 0.5
    bias = jax.random.normal(kb, (2,), dtype=jnp.float32) * 0.1

    fwd = jax.jit(model_forward)
    out = jax.block_until_ready(fwd(x1, x2, weight, bias))

    # Pure-JAX reference check (mirrors the PyTorch forward).
    v1 = jnp.concatenate([x1, x2], axis=1)
    s = min(x2.shape[3] * x2.shape[3], v1.shape[1])
    v4 = jnp.concatenate([v1, v1[:, 0:s]], axis=1)
    ref = v4 @ weight.T + bias
    assert out.shape == ref.shape == (2, 12, 8, 2)
    assert jnp.allclose(out, ref, atol=1e-5, rtol=1e-5), (
        float(jnp.max(jnp.abs(out - ref))))

    print("KERNEL_OK")
</pallas_src>

<mosaic_0001>
module attributes {stable_mosaic.version = 11 : i64} {
  func.func @_linear2_kernel(%arg0: memref<4xf32, #tpu.memory_space<smem>>, %arg1: memref<2xf32, #tpu.memory_space<smem>>, %arg2: memref<2x8x128xf32, #tpu.memory_space<vmem>>, %arg3: memref<2x8x128xf32, #tpu.memory_space<vmem>>, %arg4: memref<2x8x128xf32, #tpu.memory_space<vmem>>, %arg5: memref<2x8x128xf32, #tpu.memory_space<vmem>>) attributes {dimension_semantics = [], scalar_prefetch = 0 : i64, scratch_operands = 0 : i64, tpu.core_type = #tpu.core_type<tc>} {
    %c0 = arith.constant 0 : index
    %0 = memref.load %arg0[%c0] : memref<4xf32, #tpu.memory_space<smem>>
    %c1 = arith.constant 1 : index
    %1 = memref.load %arg0[%c1] : memref<4xf32, #tpu.memory_space<smem>>
    %c2 = arith.constant 2 : index
    %2 = memref.load %arg0[%c2] : memref<4xf32, #tpu.memory_space<smem>>
    %c3 = arith.constant 3 : index
    %3 = memref.load %arg0[%c3] : memref<4xf32, #tpu.memory_space<smem>>
    %c0_0 = arith.constant 0 : index
    %4 = memref.load %arg1[%c0_0] : memref<2xf32, #tpu.memory_space<smem>>
    %c1_1 = arith.constant 1 : index
    %5 = memref.load %arg1[%c1_1] : memref<2xf32, #tpu.memory_space<smem>>
    %c0_2 = arith.constant 0 : index
    %c0_3 = arith.constant 0 : index
    %c0_4 = arith.constant 0 : index
    %6 = vector.load %arg2[%c0_2, %c0_3, %c0_4] : memref<2x8x128xf32, #tpu.memory_space<vmem>>, vector<1x8x128xf32>
    %7 = vector.shape_cast %6 : vector<1x8x128xf32> to vector<8x128xf32>
    %c1_5 = arith.constant 1 : index
    %c0_6 = arith.constant 0 : index
    %c0_7 = arith.constant 0 : index
    %8 = vector.load %arg2[%c1_5, %c0_6, %c0_7] : memref<2x8x128xf32, #tpu.memory_space<vmem>>, vector<1x8x128xf32>
    %9 = vector.shape_cast %8 : vector<1x8x128xf32> to vector<8x128xf32>
    %10 = vector.broadcast %0 : f32 to vector<8x128xf32>
    %11 = arith.mulf %7, %10 : vector<8x128xf32>
    %12 = vector.broadcast %1 : f32 to vector<8x128xf32>
    %13 = arith.mulf %9, %12 : vector<8x128xf32>
    %14 = arith.addf %11, %13 : vector<8x128xf32>
    %15 = vector.broadcast %4 : f32 to vector<8x128xf32>
    %16 = arith.addf %14, %15 : vector<8x128xf32>
    %c0_8 = arith.constant 0 : index
    %c0_9 = arith.constant 0 : index
    %c0_10 = arith.constant 0 : index
    %17 = vector.load %arg4[%c0_8, %c0_9, %c0_10] : memref<2x8x128xf32, #tpu.memory_space<vmem>>, vector<1x8x128xf32>
    %18 = vector.shape_cast %17 : vector<1x8x128xf32> to vector<8x128xf32>
    %19 = vector.shape_cast %16 : vector<8x128xf32> to vector<1x8x128xf32>
    tpu.vector_store %arg4[%c0_8, %c0_9, %c0_10], %19 {strides = array<i32>} : memref<2x8x128xf32, #tpu.memory_space<vmem>>, vector<1x8x128xf32>,
    %20 = vector.broadcast %2 : f32 to vector<8x128xf32>
    %21 = arith.mulf %7, %20 : vector<8x128xf32>
    %22 = vector.broadcast %3 : f32 to vector<8x128xf32>
    %23 = arith.mulf %9, %22 : vector<8x128xf32>
    %24 = arith.addf %21, %23 : vector<8x128xf32>
    %25 = vector.broadcast %5 : f32 to vector<8x128xf32>
    %26 = arith.addf %24, %25 : vector<8x128xf32>
    %c1_11 = arith.constant 1 : index
    %c0_12 = arith.constant 0 : index
    %c0_13 = arith.constant 0 : index
    %27 = vector.load %arg4[%c1_11, %c0_12, %c0_13] : memref<2x8x128xf32, #tpu.memory_space<vmem>>, vector<1x8x128xf32>
    %28 = vector.shape_cast %27 : vector<1x8x128xf32> to vector<8x128xf32>
    %29 = vector.shape_cast %26 : vector<8x128xf32> to vector<1x8x128xf32>
    tpu.vector_store %arg4[%c1_11, %c0_12, %c0_13], %29 {strides = array<i32>} : memref<2x8x128xf32, #tpu.memory_space<vmem>>, vector<1x8x128xf32>,
    %c0_14 = arith.constant 0 : index
    %c0_15 = arith.constant 0 : index
    %c0_16 = arith.constant 0 : index
    %30 = vector.load %arg3[%c0_14, %c0_15, %c0_16] : memref<2x8x128xf32, #tpu.memory_space<vmem>>, vector<1x8x128xf32>
    %31 = vector.shape_cast %30 : vector<1x8x128xf32> to vector<8x128xf32>
    %c1_17 = arith.constant 1 : index
    %c0_18 = arith.constant 0 : index
    %c0_19 = arith.constant 0 : index
    %32 = vector.load %arg3[%c1_17, %c0_18, %c0_19] : memref<2x8x128xf32, #tpu.memory_space<vmem>>, vector<1x8x128xf32>
    %33 = vector.shape_cast %32 : vector<1x8x128xf32> to vector<8x128xf32>
    %34 = vector.broadcast %0 : f32 to vector<8x128xf32>
    %35 = arith.mulf %31, %34 : vector<8x128xf32>
    %36 = vector.broadcast %1 : f32 to vector<8x128xf32>
    %37 = arith.mulf %33, %36 : vector<8x128xf32>
    %38 = arith.addf %35, %37 : vector<8x128xf32>
    %39 = vector.broadcast %4 : f32 to vector<8x128xf32>
    %40 = arith.addf %38, %39 : vector<8x128xf32>
    %c0_20 = arith.constant 0 : index
    %c0_21 = arith.constant 0 : index
    %c0_22 = arith.constant 0 : index
    %41 = vector.load %arg5[%c0_20, %c0_21, %c0_22] : memref<2x8x128xf32, #tpu.memory_space<vmem>>, vector<1x8x128xf32>
    %42 = vector.shape_cast %41 : vector<1x8x128xf32> to vector<8x128xf32>
    %43 = vector.shape_cast %40 : vector<8x128xf32> to vector<1x8x128xf32>
    tpu.vector_store %arg5[%c0_20, %c0_21, %c0_22], %43 {strides = array<i32>} : memref<2x8x128xf32, #tpu.memory_space<vmem>>, vector<1x8x128xf32>,
    %44 = vector.broadcast %2 : f32 to vector<8x128xf32>
    %45 = arith.mulf %31, %44 : vector<8x128xf32>
    %46 = vector.broadcast %3 : f32 to vector<8x128xf32>
    %47 = arith.mulf %33, %46 : vector<8x128xf32>
    %48 = arith.addf %45, %47 : vector<8x128xf32>
    %49 = vector.broadcast %5 : f32 to vector<8x128xf32>
    %50 = arith.addf %48, %49 : vector<8x128xf32>
    %c1_23 = arith.constant 1 : index
    %c0_24 = arith.constant 0 : index
    %c0_25 = arith.constant 0 : index
    %51 = vector.load %arg5[%c1_23, %c0_24, %c0_25] : memref<2x8x128xf32, #tpu.memory_space<vmem>>, vector<1x8x128xf32>
    %52 = vector.shape_cast %51 : vector<1x8x128xf32> to vector<8x128xf32>
    %53 = vector.shape_cast %50 : vector<8x128xf32> to vector<1x8x128xf32>
    tpu.vector_store %arg5[%c1_23, %c0_24, %c0_25], %53 {strides = array<i32>} : memref<2x8x128xf32, #tpu.memory_space<vmem>>, vector<1x8x128xf32>,
    return
  }
}

</mosaic_0001>

<bundles_post_ra>
// kernel: model_forward.1
= control target key start
LH: loop header
LB: loop body
LE: loop exit
PB: predicated region body
PF: predicated region fallthrough
CT: control target
= control target key end

     0   :  { %11 = vsyncpa [#allocation3], 0  ;;  %s194_s0 = inlined_call_operand.vmem [shape: f32[4], index: 0, kind: input, shape index: {}]   ;;  %s195_s1 = inlined_call_operand.vmem [shape: f32[2], index: 1, kind: input, shape index: {}]   ;;  %s196_s2 = inlined_call_operand.vmem [shape: f32[2,8,128], index: 2, kind: input, shape index: {}]   ;;  %s197_s3 = inlined_call_operand.vmem [shape: f32[2,8,128], index: 3, kind: input, shape index: {}]   ;;  %s198_s4 = inlined_call_operand.vmem [shape: f32[2,8,128], index: 4, kind: output, shape index: {0}]   ;;  %s199_s5 = inlined_call_operand.vmem [shape: f32[2,8,128], index: 5, kind: output, shape index: {1}]  }
   0x1   :  { %s19_s20 = sshll.u32 %s194_s0, 4  ;;  %s20_s20 = int_to_ptr.vmem [resolvable:$true] %s19_s20 }
   0x2   :  { %12 = vsyncpa [#allocation5], 0  ;;  %s29_s23 = sshll.u32 %s195_s1, 4  ;;  %s104_s24 = scalar_lea.vmem %s20_s20, 16  ;;  %s30_s23 = int_to_ptr.vmem [resolvable:$true] %s29_s23 }
   0x3   :  { %p105_p0 = scmp.ne.s32.totalorder %s20_s20, %s104_s24  ;;  %p109_p1 = scmp.lt.s32.totalorder %s20_s20, %s20_s20 }
   0x4   :  { %p110_p2 = scmp.lt.s32.totalorder %s104_s24, %s104_s24 }
   0x6   :  { %p111_p3 = por %p110_p2, %p109_p1 }
   0x8   :  { %p112_p4 = pnand %p111_p3, %p105_p0 }
   0xa   :  { %115 = shalt.err (!%p112_p4)
}
   0xb   :  { %s132_s25 = smov [#allocation2]   ;;  %s116_s26 = scalar_lea.vmem %s30_s23, 16 }
   0xc   :  { %22 = dma.vmem_to_smem %s20_s20, 16, %s132_s25, [#allocation3]  }
   0xd   :  { %p117_p5 = scmp.ne.s32.totalorder %s30_s23, %s116_s26  ;;  %p121_p6 = scmp.lt.s32.totalorder %s30_s23, %s30_s23 }
   0xe   :  { %p122_p7 = scmp.lt.s32.totalorder %s116_s26, %s116_s26 }
  0x10   :  { %p123_p8 = por %p122_p7, %p121_p6 }
  0x12   :  { %p124_p9 = pnand %p123_p8, %p117_p5 }
  0x14   :  { %127 = shalt.err (!%p124_p9)
}
  0x15   :  { %s133_s0 = smov [#allocation4]  }
  0x16   :  { %32 = dma.vmem_to_smem %s30_s23, 16, %s133_s0, [#allocation5]  }
  0x17   :  { %128 = dma.done.wait [#allocation3], 16  }
  0x18   :  { %129 = vsyncadd [#allocation3], 4294967280 }
  0x19   :  { %130 = dma.done.wait [#allocation5], 16  }
  0x1a   :  { %131 = vsyncadd [#allocation5], 4294967280 }
  0x1b   :  { %43 = sfence }
  0x1c   :  { %s44_s1 = sld [smem:[#allocation2]]  ;;  %s94_s27 = sld [smem:[#allocation2 + $0x1]]  ;;  %v50_v0 = vld [vmem:[%s196_s2] sm:$0xff]  ;;  %v98_v1 = vld [vmem:[%s196_s2 + $0x8] sm:$0xff] }
  0x1d   :  { %s48_s28 = sld [smem:[#allocation4]]  ;;  %s95_s29 = sld [smem:[#allocation2 + $0x2]]  ;;  %v70_v2 = vld [vmem:[%s197_s3] sm:$0xff]  ;;  %v100_v5 = vld [vmem:[%s197_s3 + $0x8] sm:$0xff] }
  0x1e   :  { %s96_s30 = sld [smem:[#allocation2 + $0x3]]  ;;  %s97_s6 = sld [smem:[#allocation4 + $0x1]] }
  0x22   :  { %v53_v3 = vstv %s44_s1  ;;  %v55_v4 = vstv %s94_s27 }
  0x23   :  { %v54_v6 = vmul.f32 %v53_v3, %v50_v0  ;;  %v56_v7 = vmul.f32 %v98_v1, %v55_v4  ;;  %v61_v8 = vstv %s95_s29  ;;  %v58_v9 = vstv %s48_s28 }
  0x24   :  { %v62_v10 = vmul.f32 %v61_v8, %v50_v0  ;;  %v63_v11 = vstv %s96_s30  ;;  %v73_v12 = vmul.f32 %v70_v2, %v53_v3  ;;  %v74_v15 = vmul.f32 %v100_v5, %v55_v4 }
  0x25   :  { %v57_v13 = vadd.f32 %v56_v7, %v54_v6  ;;  %v64_v14 = vmul.f32 %v98_v1, %v63_v11  ;;  %v78_v16 = vmul.f32 %v70_v2, %v61_v8  ;;  %v66_v17 = vstv %s97_s6 }
  0x26   :  { %v79_v18 = vmul.f32 %v100_v5, %v63_v11  ;;  %v75_v21 = vadd.f32 %v74_v15, %v73_v12 }
  0x27   :  { %v59_v19 = vadd.f32 %v58_v9, %v57_v13  ;;  %v65_v20 = vadd.f32 %v64_v14, %v62_v10 }
  0x28   :  { %v80_v22 = vadd.f32 %v79_v18, %v78_v16  ;;  %v76_v24 = vadd.f32 %v75_v21, %v58_v9 }
  0x29   :  { %60 = vst [vmem:[%s198_s4] sm:$0xff] %v59_v19  ;;  %v67_v23 = vadd.f32 %v66_v17, %v65_v20 }
  0x2a   :  { %v81_v25 = vadd.f32 %v80_v22, %v66_v17  ;;  %77 = vst [vmem:[%s199_s5] sm:$0xff] %v76_v24 }
  0x2b   :  { %99 = vst [vmem:[%s198_s4 + $0x8] sm:$0xff] %v67_v23 }
  0x2c   :  { %101 = vst [vmem:[%s199_s5 + $0x8] sm:$0xff] %v81_v25 }
  0x2d   :  { %92 = vsyncpa [#allocation3], 1 }
  0x2e   :  { %93 = vsyncpa [#allocation5], 1 }

</bundles_post_ra>
